<compile_context>
chip_gen: v6e
topology: v6e:2x2x1
jax: 0.10.0
libtpu: 0.0.40
codegen_flags: <defaults>
</compile_context>

<pallas_src>
import functools
import math

import jax
import jax.numpy as jnp
from jax import lax
from jax.experimental import pallas as pl
from jax.experimental.pallas import tpu as pltpu

HIDDEN = 64
OUT_FEATURES = 11   # 1 opacity + 3 features_dc + 4 rotation + 3 scaling


def _round_up(x, m):
    return (x + m - 1) // m * m


def _softplus(x):
    # Matches torch.nn.Softplus(beta=1, threshold=20); computed in f32.
    return jnp.where(x > 20.0, x, jnp.log1p(jnp.exp(jnp.minimum(x, 20.0))))


def osg_decoder_kernel(x_ref, w1_ref, b1_ref, w2_ref, b2_ref, w3_ref, b3_ref,
                       out_ref):
    # Transposed orientation: rows (N*M sample points) are on lanes.
    #   x_ref:   (K_PAD, TM) bf16  rows [0:C) = sum_p(feat), [C:C+3) = xyz, rest 0
    #   weights: natural torch (out, in) layout, bf16, gain (and 1/P) pre-applied
    #   biases:  f32 (out, 1); out_ref: (OUT_FEATURES, TM) f32
    x = x_ref[...]                                                  # bf16
    h1 = _softplus(
        jnp.dot(w1_ref[...], x, preferred_element_type=jnp.float32)
        + b1_ref[...])                                              # (H, TM) f32
    h2 = _softplus(
        jnp.dot(w2_ref[...], h1.astype(jnp.bfloat16),
                preferred_element_type=jnp.float32) + b2_ref[...])  # (H, TM) f32
    y = (jnp.dot(w3_ref[...], h2.astype(jnp.bfloat16),
                 preferred_element_type=jnp.float32)
         + b3_ref[...])                                             # (11, TM) f32

    # Per-output-channel activations; channels live on sublanes, so select by
    # row index (pure VPU selects, no narrow sublane slicing in the kernel).
    row = lax.broadcasted_iota(jnp.int32, y.shape, 0)
    opac = y + 10.0
    fdc = jax.nn.sigmoid(y) * (1.0 + 2.0 * 0.001) - 0.001
    scl = jnp.maximum(y, 0.0) * -1.0 - 5.0
    out_ref[...] = jnp.where(row == 0, opac,
                   jnp.where(row <= 3, fdc,
                   jnp.where(row <= 7, y, scl)))


def init_params(key, n_features):
    # FullyConnectedLayer init: weight = randn([out, in]), effective forward
    # weight = weight * (lr_multiplier / sqrt(in)) with lr_multiplier=1, bias=0.
    # Stored in natural (out, in) layout with the gain pre-applied; bias (out,1).
    k1, k2, k3 = jax.random.split(key, 3)

    def fc(k, din, dout):
        w = jax.random.normal(k, (dout, din), jnp.float32) * (1.0 / math.sqrt(din))
        b = jnp.zeros((dout, 1), jnp.float32)
        return w, b

    w1, b1 = fc(k1, n_features, HIDDEN)
    w2, b2 = fc(k2, HIDDEN, HIDDEN)
    w3, b3 = fc(k3, HIDDEN, OUT_FEATURES)
    return (w1, b1, w2, b2, w3, b3)


@functools.partial(jax.jit, static_argnames=("tm",))
def osg_decoder_forward(sampled_features, xyz, params, *, tm=4096):
    """sampled_features: (N, P, M, C), xyz: (N*M, 3)."""
    N, P, M, C = sampled_features.shape
    NM = N * M
    w1, b1, w2, b2, w3, b3 = params
    assert w1.shape == (HIDDEN, C + 3)
    K_PAD = _round_up(C + 3, 8)                 # combined feat+xyz input rows

    # Row tile on lanes: multiple of 128, capped at the problem size and capped
    # so the grid keeps >= 2 steps (shards across v7x's two TensorCores).
    nmp_min = _round_up(NM, 128)
    tm = max(128, _round_up(tm, 128))
    tm = min(tm, nmp_min)
    if nmp_min >= 256:
        tm = min(tm, max(128, _round_up(-(-NM // 2), 128)))
    NMp = _round_up(NM, tm)                     # remainder handled via zero pad

    compute_dtype = jnp.bfloat16

    # Plane reduction + layout change in XLA, directly to the lane-dense bf16
    # slab the kernel reads (the 1/P mean is folded into the layer-1 weights).
    feat_sum = jnp.sum(sampled_features.astype(jnp.float32), axis=1).reshape(NM, C)
    parts = [feat_sum, xyz.astype(jnp.float32)]
    if K_PAD > C + 3:
        parts.append(jnp.zeros((NM, K_PAD - (C + 3)), jnp.float32))
    x_t = jnp.concatenate(parts, axis=-1).astype(compute_dtype).T   # (K_PAD, NM)
    if NMp != NM:
        x_t = jnp.pad(x_t, ((0, 0), (0, NMp - NM)))

    # Combined layer-1 weight (feature part scaled by 1/P, xyz part, zero pad),
    # all matmul weights in bf16; biases stay f32 (added to f32 accumulators).
    w1c = jnp.zeros((HIDDEN, K_PAD), jnp.float32)
    w1c = w1c.at[:, :C].set(w1[:, :C] * (1.0 / P))
    w1c = w1c.at[:, C:C + 3].set(w1[:, C:])
    w1c = w1c.astype(compute_dtype)
    w2c = w2.astype(compute_dtype)
    w3c = w3.astype(compute_dtype)
    b1c = b1.astype(jnp.float32)
    b2c = b2.astype(jnp.float32)
    b3c = b3.astype(jnp.float32)

    flops = int(2 * NMp * (K_PAD * HIDDEN + HIDDEN * HIDDEN + HIDDEN * OUT_FEATURES))
    transcendentals = int(NMp * (2 * HIDDEN + OUT_FEATURES))
    bytes_accessed = int(
        x_t.size * x_t.dtype.itemsize
        + (w1c.size + w2c.size + w3c.size) * 2
        + (b1c.size + b2c.size + b3c.size) * 4
        + OUT_FEATURES * NMp * 4)

    rep = lambda i: (0, 0)
    y = pl.pallas_call(
        osg_decoder_kernel,
        out_shape=jax.ShapeDtypeStruct((OUT_FEATURES, NMp), jnp.float32),
        grid=(NMp // tm,),
        in_specs=[
            pl.BlockSpec((K_PAD, tm), lambda i: (0, i)),
            pl.BlockSpec((HIDDEN, K_PAD), rep),
            pl.BlockSpec((HIDDEN, 1), rep),
            pl.BlockSpec((HIDDEN, HIDDEN), rep),
            pl.BlockSpec((HIDDEN, 1), rep),
            pl.BlockSpec((OUT_FEATURES, HIDDEN), rep),
            pl.BlockSpec((OUT_FEATURES, 1), rep),
        ],
        out_specs=pl.BlockSpec((OUT_FEATURES, tm), lambda i: (0, i)),
        compiler_params=pltpu.CompilerParams(
            dimension_semantics=("parallel",),
            vmem_limit_bytes=32 * 1024 * 1024,
            # Let XLA stream the reduce/transpose producer into operand 0 so the
            # lane-dense copy is (ideally) never materialized in HBM.
            allow_input_fusion=[True, False, False, False, False, False, False]),
        cost_estimate=pl.CostEstimate(
            flops=flops, transcendentals=transcendentals,
            bytes_accessed=bytes_accessed),
    )(x_t, w1c, b1c, w2c, b2c, w3c, b3c)

    # Layout plumbing back to the module's output shapes (pad columns dropped
    # before the transpose; only the 11 real channels were ever written).
    y = y[:, :NM].T                                                 # (NM, 11)
    return {
        "_features_dc": y[:, 1:4].reshape(N, M, 3),
        "_rotation": y[:, 4:8].reshape(N, M, 4),
        "_scaling": y[:, 8:11].reshape(N, M, 3),
        "_opacity": y[:, 0:1].reshape(N, M, 1),
    }


def osg_decoder_reference(sampled_features, xyz, params):
    """Pure-JAX f32 reference mirroring the PyTorch forward."""
    w1, b1, w2, b2, w3, b3 = params
    x = jnp.mean(sampled_features.astype(jnp.float32), axis=1)   # (N, M, C)
    N, M, C = x.shape
    x = x.reshape(N * M, C)
    x = jnp.concatenate([x, xyz], axis=-1)
    x = _softplus(x @ w1.T + b1.T)
    x = _softplus(x @ w2.T + b2.T)
    x = (x @ w3.T + b3.T).reshape(N, M, -1)
    return {
        "_features_dc": jax.nn.sigmoid(x[..., 1:4]) * (1.0 + 2.0 * 0.001) - 0.001,
        "_rotation": x[..., 4:8],
        "_scaling": jnp.maximum(x[..., 8:11], 0.0) * -1.0 - 5.0,
        "_opacity": x[..., 0:1] + 10.0,
    }


if __name__ == "__main__":
    key = jax.random.PRNGKey(0)
    k_sf, k_xyz, k_par = jax.random.split(key, 3)

    N, P, M, C = 2, 3, 256, 4          # small shapes; N*M = 512 rows
    n_features = C + 3                 # FC input = triplane features + xyz

    sampled_features = jax.random.normal(k_sf, (N, P, M, C), jnp.float32)
    xyz = jax.random.normal(k_xyz, (N * M, 3), jnp.float32)
    params = init_params(k_par, n_features)

    out = osg_decoder_forward(sampled_features, xyz, params)
    jax.block_until_ready(out)

    ref = osg_decoder_reference(sampled_features, xyz, params)
    # bf16 matmul operands (f32 accumulation) => compare with a bf16-level
    # tolerance against the f32 reference.
    for name in ("_features_dc", "_rotation", "_scaling", "_opacity"):
        assert out[name].shape == ref[name].shape, name
        assert jnp.allclose(out[name], ref[name], rtol=5e-2, atol=5e-2), name

    print("KERNEL_OK")
</pallas_src>

<mosaic_0001>
module attributes {stable_mosaic.version = 11 : i64} {
  func.func @osg_decoder_kernel(%arg0: i32, %arg1: memref<8x256xbf16, #tpu.memory_space<vmem>>, %arg2: memref<64x8xbf16, #tpu.memory_space<vmem>>, %arg3: memref<64x1xf32, #tpu.memory_space<vmem>>, %arg4: memref<64x64xbf16, #tpu.memory_space<vmem>>, %arg5: memref<64x1xf32, #tpu.memory_space<vmem>>, %arg6: memref<11x64xbf16, #tpu.memory_space<vmem>>, %arg7: memref<11x1xf32, #tpu.memory_space<vmem>>, %arg8: memref<11x256xf32, #tpu.memory_space<vmem>>) attributes {dimension_semantics = [#tpu.dimension_semantics<parallel>], iteration_bounds = array<i64: 2>, scalar_prefetch = 0 : i64, scratch_operands = 0 : i64, tpu.core_type = #tpu.core_type<tc>, window_params = [{transform_indices = @transform_0, window_bounds = array<i64: 8, 256>}, {pipeline_mode = #tpu.pipeline_mode<synchronous>, transform_indices = @transform_1, window_bounds = array<i64: 64, 8>}, {pipeline_mode = #tpu.pipeline_mode<synchronous>, transform_indices = @transform_2, window_bounds = array<i64: 64, 1>}, {pipeline_mode = #tpu.pipeline_mode<synchronous>, transform_indices = @transform_3, window_bounds = array<i64: 64, 64>}, {pipeline_mode = #tpu.pipeline_mode<synchronous>, transform_indices = @transform_4, window_bounds = array<i64: 64, 1>}, {pipeline_mode = #tpu.pipeline_mode<synchronous>, transform_indices = @transform_5, window_bounds = array<i64: 11, 64>}, {pipeline_mode = #tpu.pipeline_mode<synchronous>, transform_indices = @transform_6, window_bounds = array<i64: 11, 1>}, {transform_indices = @transform_7, window_bounds = array<i64: 11, 256>}]} {
    %c0 = arith.constant 0 : index
    %c0_0 = arith.constant 0 : index
    %0 = vector.load %arg1[%c0, %c0_0] : memref<8x256xbf16, #tpu.memory_space<vmem>>, vector<8x256xbf16>
    %c0_1 = arith.constant 0 : index
    %c0_2 = arith.constant 0 : index
    %1 = vector.load %arg2[%c0_1, %c0_2] : memref<64x8xbf16, #tpu.memory_space<vmem>>, vector<64x8xbf16>
    %cst = arith.constant dense<0.000000e+00> : vector<64x256xf32>
    %2 = tpu.matmul %1, %0, %cst {dimension_numbers = #tpu.dot_dimension_numbers<[1], [0], [0], [1], [0, 0, 1, 1], [], []>} : vector<64x8xbf16>, vector<8x256xbf16>, vector<64x256xf32> -> vector<64x256xf32>
    %c0_3 = arith.constant 0 : index
    %c0_4 = arith.constant 0 : index
    %3 = vector.load %arg3[%c0_3, %c0_4] : memref<64x1xf32, #tpu.memory_space<vmem>>, vector<64x1xf32>
    %4 = vector.broadcast %3 : vector<64x1xf32> to vector<64x256xf32>
    %5 = arith.addf %2, %4 : vector<64x256xf32>
    %cst_5 = arith.constant 2.000000e+01 : f32
    %6 = vector.broadcast %cst_5 : f32 to vector<64x256xf32>
    %7 = arith.cmpf ogt, %5, %6 : vector<64x256xf32>
    %cst_6 = arith.constant 2.000000e+01 : f32
    %8 = vector.broadcast %cst_6 : f32 to vector<64x256xf32>
    %9 = arith.minimumf %5, %8 : vector<64x256xf32>
    %10 = math.exp %9 : vector<64x256xf32>
    %11 = math.log1p %10 : vector<64x256xf32>
    %12 = arith.select %7, %5, %11 : vector<64x256xi1>, vector<64x256xf32>
    %c0_7 = arith.constant 0 : index
    %c0_8 = arith.constant 0 : index
    %13 = vector.load %arg4[%c0_7, %c0_8] : memref<64x64xbf16, #tpu.memory_space<vmem>>, vector<64x64xbf16>
    %14 = arith.truncf %12 : vector<64x256xf32> to vector<64x256xbf16>
    %cst_9 = arith.constant dense<0.000000e+00> : vector<64x256xf32>
    %15 = tpu.matmul %13, %14, %cst_9 {dimension_numbers = #tpu.dot_dimension_numbers<[1], [0], [0], [1], [0, 0, 1, 1], [], []>} : vector<64x64xbf16>, vector<64x256xbf16>, vector<64x256xf32> -> vector<64x256xf32>
    %c0_10 = arith.constant 0 : index
    %c0_11 = arith.constant 0 : index
    %16 = vector.load %arg5[%c0_10, %c0_11] : memref<64x1xf32, #tpu.memory_space<vmem>>, vector<64x1xf32>
    %17 = vector.broadcast %16 : vector<64x1xf32> to vector<64x256xf32>
    %18 = arith.addf %15, %17 : vector<64x256xf32>
    %cst_12 = arith.constant 2.000000e+01 : f32
    %19 = vector.broadcast %cst_12 : f32 to vector<64x256xf32>
    %20 = arith.cmpf ogt, %18, %19 : vector<64x256xf32>
    %cst_13 = arith.constant 2.000000e+01 : f32
    %21 = vector.broadcast %cst_13 : f32 to vector<64x256xf32>
    %22 = arith.minimumf %18, %21 : vector<64x256xf32>
    %23 = math.exp %22 : vector<64x256xf32>
    %24 = math.log1p %23 : vector<64x256xf32>
    %25 = arith.select %20, %18, %24 : vector<64x256xi1>, vector<64x256xf32>
    %c0_14 = arith.constant 0 : index
    %c0_15 = arith.constant 0 : index
    %26 = vector.load %arg6[%c0_14, %c0_15] : memref<11x64xbf16, #tpu.memory_space<vmem>>, vector<11x64xbf16>
    %27 = arith.truncf %25 : vector<64x256xf32> to vector<64x256xbf16>
    %cst_16 = arith.constant dense<0.000000e+00> : vector<11x256xf32>
    %28 = tpu.matmul %26, %27, %cst_16 {dimension_numbers = #tpu.dot_dimension_numbers<[1], [0], [0], [1], [0, 0, 1, 1], [], []>} : vector<11x64xbf16>, vector<64x256xbf16>, vector<11x256xf32> -> vector<11x256xf32>
    %c0_17 = arith.constant 0 : index
    %c0_18 = arith.constant 0 : index
    %29 = vector.load %arg7[%c0_17, %c0_18] : memref<11x1xf32, #tpu.memory_space<vmem>>, vector<11x1xf32>
    %30 = vector.broadcast %29 : vector<11x1xf32> to vector<11x256xf32>
    %31 = arith.addf %28, %30 : vector<11x256xf32>
    %32 = tpu.iota {dimensions = array<i32: 0>} : vector<11x256xi32>
    %cst_19 = arith.constant 1.000000e+01 : f32
    %33 = vector.broadcast %cst_19 : f32 to vector<11x256xf32>
    %34 = arith.addf %31, %33 : vector<11x256xf32>
    %35 = arith.negf %31 : vector<11x256xf32>
    %36 = math.exp %35 : vector<11x256xf32>
    %cst_20 = arith.constant 1.000000e+00 : f32
    %37 = vector.broadcast %cst_20 : f32 to vector<11x256xf32>
    %38 = arith.addf %37, %36 : vector<11x256xf32>
    %39 = arith.divf %37, %38 : vector<11x256xf32>
    %cst_21 = arith.constant 1.002000e+00 : f32
    %40 = vector.broadcast %cst_21 : f32 to vector<11x256xf32>
    %41 = arith.mulf %39, %40 : vector<11x256xf32>
    %cst_22 = arith.constant 1.000000e-03 : f32
    %42 = vector.broadcast %cst_22 : f32 to vector<11x256xf32>
    %43 = arith.subf %41, %42 : vector<11x256xf32>
    %cst_23 = arith.constant 0.000000e+00 : f32
    %44 = vector.broadcast %cst_23 : f32 to vector<11x256xf32>
    %45 = arith.maximumf %31, %44 : vector<11x256xf32>
    %cst_24 = arith.constant -1.000000e+00 : f32
    %46 = vector.broadcast %cst_24 : f32 to vector<11x256xf32>
    %47 = arith.mulf %45, %46 : vector<11x256xf32>
    %cst_25 = arith.constant 5.000000e+00 : f32
    %48 = vector.broadcast %cst_25 : f32 to vector<11x256xf32>
    %49 = arith.subf %47, %48 : vector<11x256xf32>
    %c0_i32 = arith.constant 0 : i32
    %50 = vector.broadcast %c0_i32 : i32 to vector<11x256xi32>
    %51 = arith.cmpi eq, %32, %50 : vector<11x256xi32>
    %c3_i32 = arith.constant 3 : i32
    %52 = vector.broadcast %c3_i32 : i32 to vector<11x256xi32>
    %53 = arith.cmpi sle, %32, %52 : vector<11x256xi32>
    %c7_i32 = arith.constant 7 : i32
    %54 = vector.broadcast %c7_i32 : i32 to vector<11x256xi32>
    %55 = arith.cmpi sle, %32, %54 : vector<11x256xi32>
    %56 = arith.select %55, %31, %49 : vector<11x256xi1>, vector<11x256xf32>
    %57 = arith.select %53, %43, %56 : vector<11x256xi1>, vector<11x256xf32>
    %58 = arith.select %51, %34, %57 : vector<11x256xi1>, vector<11x256xf32>
    %c0_26 = arith.constant 0 : index
    %c0_27 = arith.constant 0 : index
    %59 = vector.load %arg8[%c0_26, %c0_27] : memref<11x256xf32, #tpu.memory_space<vmem>>, vector<11x256xf32>
    tpu.vector_store %arg8[%c0_26, %c0_27], %58 {strides = array<i32>} : memref<11x256xf32, #tpu.memory_space<vmem>>, vector<11x256xf32>,
    return
  }
  func.func @transform_0(%arg0: i32) -> (i32, i32) {
    %c0_i32 = arith.constant 0 : i32
    %c0_i32_0 = arith.constant 0 : i32
    return %c0_i32, %arg0 : i32, i32
  }
  func.func @transform_1(%arg0: i32) -> (i32, i32) {
    %c0_i32 = arith.constant 0 : i32
    %c0_i32_0 = arith.constant 0 : i32
    %c0_i32_1 = arith.constant 0 : i32
    return %c0_i32, %c0_i32_0 : i32, i32
  }
  func.func @transform_2(%arg0: i32) -> (i32, i32) {
    %c0_i32 = arith.constant 0 : i32
    %c0_i32_0 = arith.constant 0 : i32
    %c0_i32_1 = arith.constant 0 : i32
    return %c0_i32, %c0_i32_0 : i32, i32
  }
  func.func @transform_3(%arg0: i32) -> (i32, i32) {
    %c0_i32 = arith.constant 0 : i32
    %c0_i32_0 = arith.constant 0 : i32
    %c0_i32_1 = arith.constant 0 : i32
    return %c0_i32, %c0_i32_0 : i32, i32
  }
  func.func @transform_4(%arg0: i32) -> (i32, i32) {
    %c0_i32 = arith.constant 0 : i32
    %c0_i32_0 = arith.constant 0 : i32
    %c0_i32_1 = arith.constant 0 : i32
    return %c0_i32, %c0_i32_0 : i32, i32
  }
  func.func @transform_5(%arg0: i32) -> (i32, i32) {
    %c0_i32 = arith.constant 0 : i32
    %c0_i32_0 = arith.constant 0 : i32
    %c0_i32_1 = arith.constant 0 : i32
    return %c0_i32, %c0_i32_0 : i32, i32
  }
  func.func @transform_6(%arg0: i32) -> (i32, i32) {
    %c0_i32 = arith.constant 0 : i32
    %c0_i32_0 = arith.constant 0 : i32
    %c0_i32_1 = arith.constant 0 : i32
    return %c0_i32, %c0_i32_0 : i32, i32
  }
  func.func @transform_7(%arg0: i32) -> (i32, i32) {
    %c0_i32 = arith.constant 0 : i32
    %c0_i32_0 = arith.constant 0 : i32
    return %c0_i32, %arg0 : i32, i32
  }
}

</mosaic_0001>

<bundles_post_ra>
// kernel: osg_decoder_forward.2
= control target key start
LH: loop header
LB: loop body
LE: loop exit
PB: predicated region body
PF: predicated region fallthrough
CT: control target
= control target key end

     0   :  { %s2731_s0 = inlined_call_operand.vmem [shape: bf16[64,8], index: 0, kind: input, shape index: {}]   ;;  %s2732_s1 = inlined_call_operand.vmem [shape: f32[64,1], index: 1, kind: input, shape index: {}]   ;;  %s2733_s2 = inlined_call_operand.vmem [shape: bf16[64,64], index: 2, kind: input, shape index: {}]   ;;  %s2734_s3 = inlined_call_operand.vmem [shape: f32[64,1], index: 3, kind: input, shape index: {}]   ;;  %s2735_s4 = inlined_call_operand.vmem [shape: bf16[11,64], index: 4, kind: input, shape index: {}]   ;;  %s2736_s5 = inlined_call_operand.vmem [shape: f32[11,1], index: 5, kind: input, shape index: {}]   ;;  %s2737_s6 = inlined_call_operand.vmem [shape: bf16[512,3], index: 6, kind: input, shape index: {}]   ;;  %s2738_s7 = inlined_call_operand.<no memory space> [shape: bf16[], index: 7, kind: input, shape index: {}]   ;;  %s2739_s8 = inlined_call_operand.vmem [shape: bf16[512,4], index: 8, kind: input, shape index: {}]   ;;  %s2740_s9 = inlined_call_operand.vmem [shape: bf16[8], index: 9, kind: input, shape index: {}]   ;;  %s2741_s10 = inlined_call_operand.vmem [shape: f32[11,512], index: 10, kind: output, shape index: {}]  }
   0x1   :  { %v15_v0 = vstv %s2738_s7 }
   0x2   :  { %v1859_v1 = vunpack.i.l.bf16 %v15_v0 }
   0x4   :  { %2768 = vst [vmem:[#allocation14_spill] sm:$0xff] %v1859_v1 }
   0x5   :  { %s1861_s15 = smov 0   ;;  %s1863_s16 = smov 0  }
   0x6   :  { %s1865_s17 = smov 0  }
   0x7 LB: > { %s1874_s7 = sadd.s32 4294967295, %s1797_s17   ;;  %s1876_s18 = sadd.s32 1, %s1797_s17   ;;  %s1789_s15 = sphi %s1861_s15, %s2880_s15   ;;  %s1797_s17 = sphi %s1865_s17, %s2882_s17   ;;  %s1793_s16 = sphi %s1863_s16, %s2881_s16  }
   0x8   : > { %s237_s19 = ssub.s32 %s1797_s17, %s1876_s18  ;;  %s240_s20 = sadd.s32 1, %s1793_s16 }
   0x9   : > { %p238_p0 = scmp.eq.s32.totalorder %s237_s19, 0  ;;  %p250_p1 = scmp.ne.s32.totalorder %s1793_s16, %s1789_s15 }
   0xa   : > { %p251_p2 = scmp.eq.s32.totalorder %s1874_s7, 1  ;;  %p1553_p3 = scmp.ge.s32.totalorder %s1797_s17, 1 }
   0xb   : > { %v2769_v1 = vld [vmem:[#allocation14_spill] sm:$0xff]  ;;  %s1884_s21 = scalar_select %p238_p0, %s1793_s16, %s240_s20  }
   0xc   : > { %p1886_p4 = por %p251_p2, %p250_p1  ;;  %p326_p5 = scmp.lt.s32.totalorder %s1797_s17, 3 }
   0xe   : > { %p327_p6 = pnand %p1553_p3, %p326_p5 }
  0x10   : > { %330 = sbr.rel (%p327_p6) target bundleno = 964 (0x3c4), region = 56 }
  0x15   : > { %v437_v2 = vld [vmem:[%s2740_s9] ss:$0 sm:$0xff]  ;;  %v2742_v4 = vmov 0   ;;  %v525_v5 = vld [vmem:[%s2732_s1 + $0x38] sm:$0xff]  ;;  %v524_v6 = vld [vmem:[%s2732_s1 + $0x30] sm:$0xff]  ;;  %s1555_s11 = sshll.u32 %s1874_s7, 1  ;;  %v415_v23 = vlaneseq }
  0x16   : > { %v438_v3 = vunpack.i.l.bf16 %v437_v2  ;;  %643 = vmatprep.mubr.bf16.mxu0 %v2742_v4  ;;  %1627 = vset.pattern.permute.xlu1 %v2742_v4  ;;  %v522_v7 = vld [vmem:[%s2732_s1 + $0x20] sm:$0xff]  ;;  %v520_v8 = vld [vmem:[%s2732_s1 + $0x10] sm:$0xff]  ;;  %v523_v9 = vld [vmem:[%s2732_s1 + $0x28] sm:$0xff]  ;;  %p381_p7 = scmp.lt.s32.totalorder %s1555_s11, 3  ;;  %vm420_vm1 = vcmask 1043456   ;;  %v1800_v47 = vmov 0.0  }
  0x17   : > { %1626 = vset.pattern.permute.xlu0 %v2742_v4  ;;  %1037 = vmatprep.mubr.bf16.mxu1 %v2742_v4  ;;  %v518_v10 = vld [vmem:[%s2732_s1] sm:$0xff]  ;;  %v521_v11 = vld [vmem:[%s2732_s1 + $0x18] sm:$0xff]  ;;  %v930_v12 = vld [vmem:[%s2734_s3 + $0x30] sm:$0xff]  ;;  %v1952_v24 = vshrl.u32 %v415_v23, 7  ;;  %vm591_vm3 = vcmask 64512   ;;  %s371_s27 = sand.u32 1, %s1789_s15  }
  0x18   : > { %443 = vbcast.lane.b32.xlu0 %v438_v3, 256  ;;  %563 = vperm.xlu1 %1627, %v525_v5   ;;  %v519_v13 = vld [vmem:[%s2732_s1 + $0x8] sm:$0xff]  ;;  %v928_v14 = vld [vmem:[%s2734_s3 + $0x20] sm:$0xff]  ;;  %v931_v15 = vld [vmem:[%s2734_s3 + $0x38] sm:$0xff]  ;;  %s2884_s11 = smov (!%p381_p7, %s1555_s11), 3  ;;  %s1554_s28 = sshll.u32 %s371_s27, 5 }
  0x19   : > { %v926_v16 = vld [vmem:[%s2734_s3 + $0x10] sm:$0xff]  ;;  %v929_v17 = vld [vmem:[%s2734_s3 + $0x28] sm:$0xff]  ;;  %v924_v18 = vld [vmem:[%s2734_s3] sm:$0xff]  ;;  %s1556_s12 = sshll.u32 %s2884_s11, 1  ;;  %2771 = vst [vmem:[#allocation15_spill] sm:$0xff] %v1952_v24  ;;  %v417_v26 = vadd.s32 8, %v1952_v24 }
  0x1a   : > { %v927_v19 = vld [vmem:[%s2734_s3 + $0x18] sm:$0xff]  ;;  %v1312_v20 = vld [vmem:[%s2736_s5] sm:$0xff]  ;;  %v925_v21 = vld [vmem:[%s2734_s3 + $0x8] sm:$0xff]  ;;  %s386_s17 = scalar_lea.vmem %s2737_s6, %s1556_s12  ;;  %s396_s23 = scalar_lea.vmem %s2739_s8, %s1556_s12  ;;  %vm435_vm2 = vcmp.lt.s32.totalorder %v1952_v24, 4 }
  0x1b   : > { %v1313_v22 = vld [vmem:[%s2736_s5 + $0x8] sm:$0x7]  ;;  %v411_v25 = vld [vmem:[%s386_s17] sm:$0x3]  ;;  %v1559_v27 = vld [vmem:[%s386_s17 + $0x2] sm:$0x3] }
  0x1c   : > { %558 = vperm.xlu0 %1626, %v524_v6   ;;  %548 = vperm.xlu1 %1627, %v522_v7   ;;  %v412_v28 = vunpack.c.l.bf16 %v411_v25  ;;  %v469_v29 = vunpack.c.l.bf16 %v1559_v27  ;;  %vm418_vm0 = vcmp.lt.s32.totalorder %v417_v26, 11  ;;  %v429_v31 = vld [vmem:[%s396_s23] sm:$0x3]  ;;  %v1560_v33 = vld [vmem:[%s396_s23 + $0x2] sm:$0x3]  ;;  %v1631_v55 = vld [vmem:[%s2731_s0 + $0x8] sm:$0xff]  }
  0x1d   : > { %v430_v35 = vunpack.c.l.bf16 %v429_v31  ;;  %v488_v37 = vunpack.c.l.bf16 %v1560_v33  ;;  %v1630_v54 = vld [vmem:[%s2731_s0] sm:$0xff]   ;;  %v1632_v56 = vld [vmem:[%s2731_s0 + $0x10] sm:$0xff]   ;;  %v1633_v57 = vld [vmem:[%s2731_s0 + $0x18] sm:$0xff]   ;;  %s2703_s29 = scalar_lea.vmem [#allocation12], %s1554_s28  ;;  %s1599_s15 = sshll.u32 (%p1886_p4), %s1874_s7, 4 }
  0x1e   : > { %v419_v30 = vsel %vm418_vm0, %v412_v28, %v2769_v1  ;;  %v476_v32 = vsel %vm418_vm0, %v469_v29, %v2769_v1  ;;  %s1457_s12 = scalar_lea.vmem (%p1886_p4), %s2741_s10, %s1599_s15 }
  0x1f   : > { %v421_v34 = vsel %vm420_vm1, %v419_v30, %v2769_v1  ;;  %v478_v36 = vsel %vm420_vm1, %v476_v32, %v2769_v1  ;;  %v436_v40 = vsel %vm435_vm2, %v430_v35, %v2769_v1  ;;  %v494_v41 = vsel %vm435_vm2, %v488_v37, %v2769_v1 }
  0x20   : > { %538 = vperm.xlu0 %1626, %v520_v8   ;;  %553 = vperm.xlu1 %1627, %v523_v9   ;;  %v422_v38 = vrot.slane %v421_v34, 4  ;;  %v479_v39 = vrot.slane %v478_v36, 4 }
  0x22   : > { %v447_v42 = vmax.f32 %v436_v40, %v422_v38  ;;  %v497_v43 = vmax.f32 %v494_v41, %v479_v39 }
  0x24   : > { %528 = vperm.xlu0 %1626, %v518_v10   ;;  %543 = vperm.xlu1 %1627, %v521_v11  }
  0x28   : > { %964 = vperm.xlu0 %1626, %v930_v12   ;;  %533 = vperm.xlu1 %1627, %v519_v13  }
  0x2c   : > { %954 = vperm.xlu0 %1626, %v928_v14   ;;  %969 = vperm.xlu1 %1627, %v931_v15  }
  0x30   : > { %944 = vperm.xlu0 %1626, %v926_v16   ;;  %959 = vperm.xlu1 %1627, %v929_v17  }
  0x34   : > { %934 = vperm.xlu0 %1626, %v924_v18   ;;  %949 = vperm.xlu1 %1627, %v927_v19  }
  0x38   : > { %1316 = vperm.xlu0 %1626, %v1312_v20   ;;  %939 = vperm.xlu1 %1627, %v925_v21  }
  0x3c   : > { %1321 = vperm.xlu1 %1627, %v1313_v22  }
  0x8a   : > { %v444_v44 = vpop.permute.xlu0 %443 }
  0x8b   : > { %v451_v45 = vmax.f32 %v447_v42, %v444_v44  ;;  %v501_v46 = vmax.f32 %v497_v43, %v444_v44 }
  0x8d   : > { %v453_v48 = vpack.c.bf16 %v1800_v47, %v451_v45  ;;  %v504_v49 = vpack.c.bf16 %v1800_v47, %v501_v46 }
  0x8f   : > { %456 = vst [vmem:[#allocation13] sm:$0xf] %v453_v48  ;;  %507 = vst [vmem:[#allocation13 + $0x4] sm:$0xf] %v504_v49 }
  0x93   : > { %v1990_v59 = vpop.permute.xlu1 %563 }
  0x96   : > { %v509_v50 = vld [vmem:[#allocation13] sm:$0xff] }
  0x97   : > { %v1566_v51 = vcombine.high %v509_v50, %v509_v50  ;;  %v1565_v52 = vcombine.low %v509_v50, %v509_v50  ;;  %v1988_v58 = vpop.permute.xlu0 %558  ;;  %v549_v63 = vpop.permute.xlu1 %548 }
  0x99   : > { %1567 = vmatprep.subr.msk.bf16.mxu0 %vm420_vm1, %v1566_v51  ;;  %v606_v53 = vsel %vm420_vm1, %v1565_v52, 0 }
  0x9a   : > { %626 = vmatpush1.bf16.msra.mxu0 %v606_v53 }
  0x9b   : > { %v539_v61 = vpop.permute.xlu0 %538  ;;  %v554_v7 = vpop.permute.xlu1 %553 }
  0x9d   : > { %1568 = vmatmul.mubr.msk.bf16.vlgmr.msra.gmra.mxu0 %vm591_vm3, %v1630_v54 }
  0x9e   : > { %653 = vmatprep.mubr.bf16.mxu0 %v2742_v4 }
  0x9f   : > { %v529_v3 = vpop.permute.xlu0 %528  ;;  %v544_v15 = vpop.permute.xlu1 %543 }
  0xa3   : > { %v534_v34 = vpop.permute.xlu1 %533 }
  0xa5   : > { %1569 = vmatmul.mubr.msk.bf16.gmra.mxu0 %vm591_vm3, %v1631_v55 }
  0xa6   : > { %663 = vmatprep.mubr.bf16.mxu0 %v2742_v4 }
  0xad   : > { %1570 = vmatmul.mubr.msk.bf16.gmra.mxu0 %vm591_vm3, %v1632_v56 }
  0xae   : > { %673 = vmatprep.mubr.bf16.mxu0 %v2742_v4 }
  0xb5   : > { %1571 = vmatmul.mubr.msk.bf16.gmra.mxu0 %vm591_vm3, %v1633_v57 }
  0xb6   : > { %1364 = vmatprep.mubr.bf16.mxu0 %v2742_v4 }
 0x15d   : > { %v645_v60 = vpop.f32.mrf.mxu0 }
 0x15e   : > { %v2000_v16 = vadd.f32 %v645_v60, %v529_v3 }
 0x15f   : > { %v647_v62 = vpop.f32.mrf.mxu0 }
 0x160   : > { %v1992_v5 = vadd.f32 %v647_v62, %v529_v3  ;;  %2774 = vst [vmem:[#allocation18_spill] sm:$0xff] %v2000_v16  ;;  %v700_v27 = vmin.f32 %v2000_v16, 20.0 }
 0x161   : > { %v649_v0 = vpop.f32.mrf.mxu0 }
 0x162   : > { %2772 = vst [vmem:[#allocation16_spill] sm:$0xff] %v1992_v5  ;;  %v701_v10 = vmin.f32 %v1992_v5, 20.0  ;;  %v716_v42 = vmul.f32 1.442695, %v700_v27  ;;  %v2026_v48 = vadd.f32 %v649_v0, %v534_v34 }
 0x163   : > { %v651_v2 = vpop.f32.mrf.mxu0 }
 0x164   : > { %v718_v17 = vmul.f32 1.442695, %v701_v10  ;;  %v2018_v38 = vadd.f32 %v651_v2, %v534_v34  ;;  %2775 = vst [vmem:[#allocation19_spill] sm:$0xff] %v2026_v48 }
 0x165   : > { %v655_v6 = vpop.f32.mrf.mxu0 }
 0x166   : > { %v1997_v11 = vadd.f32 %v655_v6, %v539_v61  ;;  %1639 = vpow2.f32 %v718_v17  ;;  %v703_v49 = vmin.f32 %v2018_v38, 20.0 }
 0x167   : > { %v657_v8 = vpop.f32.mrf.mxu0 }
 0x168   : > { %v1994_v9 = vadd.f32 %v657_v8, %v539_v61  ;;  %2773 = vst [vmem:[#allocation17_spill] sm:$0xff] %v1997_v11  ;;  %v704_v18 = vmin.f32 %v1997_v11, 20.0  ;;  %v702_v61 = vmin.f32 %v2026_v48, 20.0  ;;  %v722_v62 = vmul.f32 1.442695, %v703_v49 }
 0x169   : > { %v659_v12 = vpop.f32.mrf.mxu0 }
 0x16a   : > { %v705_v13 = vmin.f32 %v1994_v9, 20.0  ;;  %v2003_v19 = vadd.f32 %v659_v12, %v544_v15  ;;  %v724_v30 = vmul.f32 1.442695, %v704_v18  ;;  %v720_v12 = vmul.f32 1.442695, %v702_v61 }
 0x16b   : > { %v661_v14 = vpop.f32.mrf.mxu0 }
 0x16c   : > { %v2005_v20 = vadd.f32 %v661_v14, %v544_v15  ;;  %v726_v22 = vmul.f32 1.442695, %v705_v13  ;;  %v706_v31 = vmin.f32 %v2003_v19, 20.0  ;;  %vm690_vm2 = vcmp.gt.f32.partialorder %v2003_v19, 20.0 }
 0x16d   : > { %v665_v21 = vpop.f32.mrf.mxu0 }
 0x16e   : > { %v2007_v23 = vadd.f32 %v665_v21, %v549_v63  ;;  %v707_v25 = vmin.f32 %v2005_v20, 20.0  ;;  %1641 = vpow2.f32 %v726_v22  ;;  %v728_v45 = vmul.f32 1.442695, %v706_v31 }
 0x16f   : > { %v667_v26 = vpop.f32.mrf.mxu0  ;;  %vm691_vm6 = vcmp.gt.f32.partialorder %v2005_v20, 20.0 }
 0x170   : > { %v708_v28 = vmin.f32 %v2007_v23, 20.0  ;;  %v2012_v29 = vadd.f32 %v667_v26, %v549_v63  ;;  %v730_v32 = vmul.f32 1.442695, %v707_v25 }
 0x171   : > { %v669_v33 = vpop.f32.mrf.mxu0 }
 0x172   : > { %v732_v35 = vmul.f32 1.442695, %v708_v28  ;;  %v709_v36 = vmin.f32 %v2012_v29, 20.0  ;;  %v2016_v37 = vadd.f32 %v669_v33, %v554_v7  ;;  %1643 = vpow2.f32 %v730_v32 }
 0x173   : > { %v671_v39 = vpop.f32.mrf.mxu0  ;;  %v2043_v3 = vpop.eup %1639 }
 0x174   : > { %1645 = vpow2.f32 %v732_v35  ;;  %v734_v40 = vmul.f32 1.442695, %v709_v36  ;;  %v710_v41 = vmin.f32 %v2016_v37, 20.0  ;;  %v2021_v43 = vadd.f32 %v671_v39, %v554_v7 }
 0x175   : > { %1647 = vpow2.f32 %v724_v30  ;;  %v675_v44 = vpop.f32.mrf.mxu0  ;;  %v757_v15 = vadd.f32 1.0, %v2043_v3  ;;  %v760_v35 = vmul.f32 -0.5, %v2043_v3  ;;  %vm694_vm1 = vcmp.gt.f32.partialorder %v2016_v37, 20.0 }
 0x176   : > { %1649 = vpow2.f32 %v734_v40  ;;  %v736_v46 = vmul.f32 1.442695, %v710_v41  ;;  %v2024_v47 = vadd.f32 %v675_v44, %v1988_v58  ;;  %v711_v50 = vmin.f32 %v2021_v43, 20.0 }
 0x177   : > { %v677_v51 = vpop.f32.mrf.mxu0 }
 0x178   : > { %1651 = vpow2.f32 %v736_v46  ;;  %v712_v52 = vmin.f32 %v2024_v47, 20.0  ;;  %v2032_v53 = vadd.f32 %v677_v51, %v1988_v58  ;;  %v738_v54 = vmul.f32 1.442695, %v711_v50 }
 0x179   : > { %1653 = vpow2.f32 %v716_v42  ;;  %v679_v55 = vpop.f32.mrf.mxu0 }
 0x17a   : > { %1655 = vpow2.f32 %v728_v45  ;;  %v740_v56 = vmul.f32 1.442695, %v712_v52  ;;  %v713_v57 = vmin.f32 %v2032_v53, 20.0  ;;  %v2036_v60 = vadd.f32 %v679_v55, %v1990_v59 }
 0x17b   : > { %1657 = vpow2.f32 %v738_v54  ;;  %v681_v63 = vpop.f32.mrf.mxu0  ;;  %v2046_v8 = vpop.eup %1641  ;;  %vm697_vm14 = vcmp.gt.f32.partialorder %v2032_v53, 20.0 }
 0x17c   : > { %1659 = vpow2.f32 %v740_v56  ;;  %v742_v0 = vmul.f32 1.442695, %v713_v57  ;;  %v714_v58 = vmin.f32 %v2036_v60, 20.0  ;;  %v2041_v2 = vadd.f32 %v681_v63, %v1990_v59 }
 0x17d   : > { %v793_v17 = vadd.f32 1.0, %v2046_v8  ;;  %v796_v40 = vmul.f32 -0.5, %v2046_v8  ;;  %v2094_v56 = vadd.f32 1.0, %v760_v35  ;;  %v799_v63 = vand.u32 2147483647, %v2046_v8 }
 0x17e   : > { %1661 = vpow2.f32 %v742_v0  ;;  %v744_v6 = vmul.f32 1.442695, %v714_v58  ;;  %v715_v7 = vmin.f32 %v2041_v2, 20.0  ;;  %vm698_vm10 = vcmp.gt.f32.partialorder %v2036_v60, 20.0 }
 0x17f   : > { %1663 = vpow2.f32 %v722_v62  ;;  %v2048_v10 = vpop.eup %1643  ;;  %v797_v62 = vadd.f32 1.0, %v796_v40  ;;  %vm2120_vm4 = vcmp.lt.f32.partialorder %v799_v63, 0.0004427343  ;;  %vm699_vm15 = vcmp.gt.f32.partialorder %v2041_v2, 20.0 }
 0x180   : > { %1665 = vpow2.f32 %v744_v6  ;;  %v746_v13 = vmul.f32 1.442695, %v715_v7  ;;  %v811_v21 = vadd.f32 1.0, %v2048_v10  ;;  %v814_v44 = vmul.f32 -0.5, %v2048_v10 }
 0x181   : > { %v2050_v14 = vpop.eup %1645  ;;  %v817_v7 = vand.u32 2147483647, %v2048_v10 }
 0x182   : > { %v2053_v59 = vpop.eup %1647  ;;  %1667 = vpow2.f32 %v746_v13  ;;  %v820_v22 = vadd.f32 1.0, %v2050_v14  ;;  %v823_v51 = vmul.f32 -0.5, %v2050_v14  ;;  %v815_v6 = vadd.f32 1.0, %v814_v44 }
 0x183   : > { %v2056_v18 = vpop.eup %1649  ;;  %1669 = vpow2.f32 %v720_v12  ;;  %v784_v26 = vadd.f32 1.0, %v2053_v59  ;;  %v787_v55 = vmul.f32 -0.5, %v2053_v59  ;;  %v826_v35 = vand.u32 2147483647, %v2050_v14 }
 0x184   : > { %1671 = vlog2.f32 %v757_v15  ;;  %v829_v28 = vadd.f32 1.0, %v2056_v18  ;;  %v832_v58 = vmul.f32 -0.5, %v2056_v18  ;;  %v824_v13 = vadd.f32 1.0, %v823_v51 }
 0x185   : > { %v2060_v25 = vpop.eup %1651  ;;  %1673 = vlog2.f32 %v793_v17  ;;  %v2127_v51 = vmul.f32 %v2048_v10, %v815_v6  ;;  %vm2129_vm5 = vcmp.lt.f32.partialorder %v817_v7, 0.0004427343  ;;  %vm2146_vm7 = vcmp.lt.f32.partialorder %v826_v35, 0.0004427343 }
 0x186   : > { %v2063_v27 = vpop.eup %1653  ;;  %v838_v31 = vadd.f32 1.0, %v2060_v25  ;;  %1675 = vlog2.f32 %v811_v21  ;;  %v844_v63 = vand.u32 2147483647, %v2060_v25 }
 0x187   : > { %2776 = vst [vmem:[#allocation20_spill] sm:$0xff] %v2063_v27  ;;  %v2066_v30 = vpop.eup %1655  ;;  %1677 = vlog2.f32 %v820_v22  ;;  %v751_v36 = vmul.f32 -0.5, %v2063_v27  ;;  %v2079_v41 = vadd.f32 1.0, %v2063_v27 }
 0x188   : > { %v2069_v32 = vpop.eup %1657  ;;  %1679 = vlog2.f32 %v784_v26  ;;  %v802_v45 = vadd.f32 1.0, %v2066_v30  ;;  %v841_v26 = vmul.f32 -0.5, %v2060_v25  ;;  %vm2175_vm12 = vcmp.lt.f32.partialorder %v844_v63, 0.0004427343 }
 0x189   : > { %v2071_v33 = vpop.eup %1659  ;;  %v847_v34 = vadd.f32 1.0, %v2069_v32  ;;  %1681 = vlog2.f32 %v829_v28  ;;  %v2096_v57 = vadd.f32 1.0, %v751_v36  ;;  %v850_v22 = vmul.f32 -0.5, %v2069_v32 }
 0x18a   : > { %v856_v39 = vadd.f32 1.0, %v2071_v33  ;;  %1683 = vlog2.f32 %v838_v31  ;;  %v2111_v28 = vadd.f32 1.0, %v787_v55  ;;  %v2118_v36 = vmul.f32 %v2046_v8, %v797_v62 }
 0x18b   : > { %v2081_v42 = vpop.eup %1661  ;;  %1685 = vlog2.f32 %v847_v34  ;;  %2777 = vst [vmem:[#allocation21_spill] sm:$0xff] %v2096_v57  ;;  %v859_v34 = vmul.f32 -0.5, %v2071_v33  ;;  %v853_v8 = vand.u32 2147483647, %v2069_v32  ;;  %v2135_v62 = vmul.f32 %v2050_v14, %v824_v13 }
 0x18c   : > { %v2086_v49 = vpop.eup %1663  ;;  %v865_v50 = vadd.f32 1.0, %v2081_v42  ;;  %1687 = vlog2.f32 %v856_v39  ;;  %v868_v44 = vmul.f32 -0.5, %v2081_v42  ;;  %v862_v4 = vand.u32 2147483647, %v2071_v33 }
 0x18d   : > { %v2091_v54 = vpop.eup %1665  ;;  %v775_v17 = vadd.f32 1.0, %v2086_v49  ;;  %v851_v6 = vadd.f32 1.0, %v850_v22  ;;  %v842_v7 = vadd.f32 1.0, %v841_v26  ;;  %v871_v52 = vand.u32 2147483647, %v2081_v42 }
 0x18e   : > { %1689 = vlog2.f32 %v865_v50  ;;  %v874_v61 = vadd.f32 1.0, %v2091_v54  ;;  %v835_v50 = vand.u32 2147483647, %v2056_v18  ;;  %v877_v10 = vmul.f32 -0.5, %v2091_v54 }
 0x18f   : > { %v2100_v0 = vpop.eup %1667  ;;  %1691 = vlog2.f32 %v802_v45  ;;  %v833_v45 = vadd.f32 1.0, %v832_v58  ;;  %v860_v13 = vadd.f32 1.0, %v859_v34  ;;  %v869_v48 = vadd.f32 1.0, %v868_v44 }
 0x190   : > { %v883_v12 = vadd.f32 1.0, %v2100_v0  ;;  %v2107_v21 = vpop.eup %1669  ;;  %1693 = vlog2.f32 %v874_v61  ;;  %v886_v14 = vmul.f32 -0.5, %v2100_v0  ;;  %v880_v16 = vand.u32 2147483647, %v2091_v54 }
 0x191   : > { %v2113_v31 = vpop.eup %1671  ;;  %v889_v27 = vand.u32 2147483647, %v2100_v0  ;;  %v2156_v57 = vmul.f32 %v2056_v18, %v833_v45  ;;  %vm2158_vm8 = vcmp.lt.f32.partialorder %v835_v50, 0.0004427343  ;;  %vm2162_vm9 = vcmp.lt.f32.partialorder %v853_v8, 0.0004427343 }
 0x192   : > { %1695 = vlog2.f32 %v883_v12  ;;  %v1674_v40 = vpop.eup %1673  ;;  %v2139_v12 = vmul.f32 -0.5, %v2066_v30  ;;  %vm2167_vm11 = vcmp.lt.f32.partialorder %v862_v4, 0.0004427343  ;;  %v852_v18 = vmul.f32 %v2069_v32, %v851_v6 }
 0x193   : > { %v1676_v61 = vpop.eup %1675  ;;  %v2152_v22 = vmul.f32 0.6931472, %v1674_v40  ;;  %1697 = vlog2.f32 %v775_v17  ;;  %v878_v40 = vadd.f32 1.0, %v877_v10  ;;  %v2173_v45 = vmul.f32 %v2060_v25, %v842_v7 }
 0x194   : > { %v1678_v58 = vpop.eup %1677  ;;  %v813_v44 = vmul.f32 0.6931472, %v1676_v61  ;;  %vm2182_vm0 = vcmp.lt.f32.partialorder %v871_v52, 0.0004427343  ;;  %v887_v61 = vadd.f32 1.0, %v886_v14  ;;  %v861_v32 = vmul.f32 %v2071_v33, %v860_v13 }
 0x195   : > { %v1680_v46 = vpop.eup %1679  ;;  %1699 = vlog2.f32 %v2079_v41  ;;  %v870_v63 = vmul.f32 %v2081_v42, %v869_v48  ;;  %vm2191_vm3 = vcmp.lt.f32.partialorder %v880_v16, 0.0004427343  ;;  %v2195_v52 = vmul.f32 0.6931472, %v1678_v58 }
 0x196   : > { %v1682_v24 = vpop.eup %1681  ;;  %vm2201_vm13 = vcmp.lt.f32.partialorder %v889_v27, 0.0004427343  ;;  %v819_v16 = vsel %vm2129_vm5, %v2127_v51, %v813_v44  ;;  %v879_v58 = vmul.f32 %v2091_v54, %v878_v40  ;;  %v2210_v13 = vmul.f32 0.6931472, %v1680_v46 }
 0x197   : > { %v1684_v26 = vpop.eup %1683  ;;  %v831_v14 = vmul.f32 0.6931472, %v1682_v24  ;;  %v778_v5 = vmul.f32 -0.5, %v2086_v49  ;;  %vm692_vm5 = vcmp.gt.f32.partialorder %v2007_v23, 20.0  ;;  %v828_v24 = vsel %vm2146_vm7, %v2135_v62, %v2195_v52 }
 0x198   : > { %v1686_v1 = vpop.eup %1685  ;;  %v840_v27 = vmul.f32 0.6931472, %v1684_v26  ;;  %v899_v46 = vsel %vm691_vm6, %v2005_v20, %v819_v16  ;;  %v806_v62 = vadd.f32 1.0, %v2139_v12  ;;  %vm687_vm6 = vcmp.gt.f32.partialorder %v2018_v38, 20.0 }
 0x199   : > { %v1688_v8 = vpop.eup %1687  ;;  %v849_v48 = vmul.f32 0.6931472, %v1686_v1  ;;  %v766_v1 = vadd.f32 1.0, %v2107_v21  ;;  %v837_v20 = vsel %vm2158_vm8, %v2156_v57, %v831_v14  ;;  %v779_v40 = vadd.f32 1.0, %v778_v5  ;;  %v2815_v14 = vld [vmem:[#allocation16_spill] sm:$0xff] }
 0x19a   : > { %v858_v42 = vmul.f32 0.6931472, %v1688_v8  ;;  %v846_v17 = vsel %vm2175_vm12, %v2173_v45, %v840_v27  ;;  %vm2798_vm7 = vcmp.gt.f32.partialorder %v2021_v43, 20.0  ;;  %vm2799_vm8 = vcmp.gt.f32.partialorder %v2024_v47, 20.0 }
 0x19b   : > { %v1690_v25 = vpop.eup %1689  ;;  %v855_v26 = vsel %vm2162_vm9, %v852_v18, %v849_v48  ;;  %1701 = vlog2.f32 %v766_v1  ;;  %v781_v18 = vand.u32 2147483647, %v2086_v49  ;;  %vm2800_vm9 = vcmp.gt.f32.partialorder %v2012_v29, 20.0 }
 0x19c   : > { %v1692_v6 = vpop.eup %1691  ;;  %v867_v41 = vmul.f32 0.6931472, %v1690_v25  ;;  %v888_v25 = vmul.f32 %v2100_v0, %v887_v61  ;;  %v864_v44 = vsel %vm2167_vm11, %v861_v32, %v858_v42  ;;  %v903_v34 = vsel %vm2798_vm7, %v2021_v43, %v855_v26  ;;  %v2814_v42 = vld [vmem:[#allocation17_spill] sm:$0xff]  ;;  %v2819_v26 = vld [vmem:[#allocation18_spill] sm:$0xff] }
 0x19d   : > { %v1694_v33 = vpop.eup %1693  ;;  %v804_v54 = vmul.f32 0.6931472, %v1692_v6  ;;  %v904_v5 = vsel %vm2799_vm8, %v2024_v47, %v864_v44  ;;  %v2801_v45 = vand.u32 2147483647, %v2066_v30  ;;  %v807_v43 = vmul.f32 %v2066_v30, %v806_v62  ;;  %v2820_v44 = vld [vmem:[#allocation19_spill] sm:$0xff] }
 0x19e   : > { %v876_v51 = vmul.f32 0.6931472, %v1694_v33  ;;  %v873_v0 = vsel %vm2182_vm0, %v870_v63, %v867_v41  ;;  %v759_v4 = vmul.f32 0.6931472, %v2113_v31  ;;  %v902_v47 = vsel %vm694_vm1, %v2016_v37, %v846_v17  ;;  %v1635_v17 = vld [vmem:[%s2733_s2 + $0x8] sm:$0xff]  }
 0x19f   : > { %v1696_v11 = vpop.eup %1695  ;;  %v905_v57 = vsel %vm697_vm14, %v2032_v53, %v873_v0  ;;  %v901_v53 = vsel %vm2800_vm9, %v2012_v29, %v837_v20  ;;  %v780_v29 = vmul.f32 %v2086_v49, %v779_v40  ;;  %v769_v63 = vmul.f32 -0.5, %v2107_v21  ;;  %v1636_v40 = vld [vmem:[%s2733_s2 + $0x10] sm:$0xff]  }
 0x1a0   : > { %v885_v55 = vmul.f32 0.6931472, %v1696_v11  ;;  %v882_v15 = vsel %vm2191_vm3, %v879_v58, %v876_v51  ;;  %v921_v32 = vpack.c.bf16 %v903_v34, %v901_v53  ;;  %v789_v52 = vmul.f32 %v2053_v59, %v2111_v28  ;;  %v2354_v34 = vpop.permute.xlu1 %969 }
 0x1a1   : > { %v906_v35 = vsel %vm698_vm10, %v2036_v60, %v882_v15  ;;  %v1698_v60 = vpop.eup %1697  ;;  %vm2264_vm10 = vcmp.lt.f32.partialorder %v2801_v45, 0.0004427343  ;;  %v762_v31 = vmul.f32 %v2043_v3, %v2094_v56  ;;  %vm2281_vm11 = vcmp.lt.f32.partialorder %v781_v18, 0.0004427343 }
 0x1a2   : > { %v891_v11 = vsel %vm2201_vm13, %v888_v25, %v885_v55  ;;  %v922_v50 = vpack.c.bf16 %v906_v35, %v904_v5  ;;  %v777_v61 = vmul.f32 0.6931472, %v1698_v60  ;;  %v1700_v10 = vpop.eup %1699  ;;  %v810_v30 = vsel %vm2264_vm10, %v807_v43, %v804_v54  ;;  %v2817_v25 = vld [vmem:[#allocation20_spill] sm:$0xff]  ;;  %v1634_v35 = vld [vmem:[%s2733_s2] sm:$0xff]  }
 0x1a3   : > { %v907_v12 = vsel %vm699_vm15, %v2041_v2, %v891_v11  ;;  %v900_v37 = vsel %vm692_vm5, %v2007_v23, %v828_v24  ;;  %v2806_v49 = vsel %vm2120_vm4, %v2118_v36, %v2152_v22  ;;  %vm2807_vm12 = vcmp.gt.f32.partialorder %v1994_v9, 20.0 }
 0x1a4   : > { %v923_v8 = vpack.c.bf16 %v907_v12, %v905_v57  ;;  %v897_v28 = vsel %vm2807_vm12, %v1994_v9, %v2806_v49  ;;  %v2808_v56 = vand.u32 2147483647, %v2053_v59  ;;  %v783_v41 = vsel %vm2281_vm11, %v780_v29, %v777_v61  ;;  %v1637_v57 = vld [vmem:[%s2733_s2 + $0x18] sm:$0xff]   ;;  %v965_v12 = vpop.permute.xlu0 %964  ;;  %v960_v60 = vpop.permute.xlu1 %959 }
 0x1a5   : > { %v920_v7 = vpack.c.bf16 %v902_v47, %v900_v37  ;;  %v919_v23 = vpack.c.bf16 %v899_v46, %v897_v28  ;;  %v2811_v36 = vand.u32 2147483647, %v2043_v3  ;;  %v898_v9 = vsel %vm690_vm2, %v2003_v19, %v810_v30  ;;  %v2816_v19 = vld [vmem:[#allocation21_spill] sm:$0xff] }
 0x1a6   : > { %1013 = vmatprep.subr.bf16.mxu1 %v923_v8  ;;  %vm2298_vm13 = vcmp.lt.f32.partialorder %v2808_v56, 0.0004427343  ;;  %v750_v48 = vmul.f32 0.6931472, %v1700_v10  ;;  %v770_v16 = vadd.f32 1.0, %v769_v63  ;;  %vm688_vm14 = vcmp.gt.f32.partialorder %v2814_v42, 20.0 }
 0x1a7   : > { %1014 = vmatpush1.bf16.msra.mxu1 %v922_v50  ;;  %v792_v39 = vsel %vm2298_vm13, %v789_v52, %v2210_v13  ;;  %vm2309_vm4 = vcmp.lt.f32.partialorder %v2811_v36, 0.0004427343  ;;  %v895_v3 = vsel %vm687_vm6, %v2018_v38, %v783_v41  ;;  %v772_v58 = vand.u32 2147483647, %v2107_v21 }
 0x1a8   : > { %1015 = vmatprep.subr.bf16.mxu1 %v921_v32  ;;  %v765_v59 = vsel %vm2309_vm4, %v762_v31, %v759_v4  ;;  %vm685_vm15 = vcmp.gt.f32.partialorder %v2815_v14, 20.0  ;;  %v896_v13 = vsel %vm688_vm14, %v2814_v42, %v792_v39  ;;  %v753_v27 = vmul.f32 %v2817_v25, %v2816_v19  ;;  %v1702_v1 = vpop.eup %1701  ;;  %v955_v18 = vpop.permute.xlu0 %954 }
 0x1a9   : > { %v918_v51 = vpack.c.bf16 %v898_v9, %v896_v13  ;;  %v893_v24 = vsel %vm685_vm15, %v2815_v14, %v765_v59  ;;  %v2818_v46 = vand.u32 2147483647, %v2817_v25  ;;  %v768_v38 = vmul.f32 0.6931472, %v1702_v1  ;;  %v950_v53 = vpop.permute.xlu1 %949 }
 0x1aa   : > { %v917_v54 = vpack.c.bf16 %v895_v3, %v893_v24  ;;  %v771_v55 = vmul.f32 %v2107_v21, %v770_v16  ;;  %vm773_vm1 = vcmp.lt.f32.partialorder %v772_v58, 0.0004427343  ;;  %vm684_vm2 = vcmp.gt.f32.partialorder %v2819_v26, 20.0 }
 0x1ab   : > { %1016 = vmatpush1.bf16.msra.mxu1 %v920_v7  ;;  %vm755_vm0 = vcmp.lt.f32.partialorder %v2818_v46, 0.0004427343  ;;  %vm686_vm3 = vcmp.gt.f32.partialorder %v2820_v44, 20.0  ;;  %vm2767_vm5 = vcmask 523264   ;;  %v2821_v21 = vmov 0  }
 0x1ac   : > { %1017 = vmatprep.subr.bf16.mxu1 %v919_v23  ;;  %v756_v0 = vsel %vm755_vm0, %v753_v27, %v750_v48  ;;  %v774_v15 = vsel %vm773_vm1, %v771_v55, %v768_v38  ;;  %v945_v8 = vpop.permute.xlu0 %944 }
 0x1ad   : > { %v892_v20 = vsel %vm684_vm2, %v2819_v26, %v756_v0  ;;  %v894_v62 = vsel %vm686_vm3, %v2820_v44, %v774_v15  ;;  %v2358_v4 = vpop.permute.xlu1 %939 }
 0x1ae   : > { %v916_v11 = vpack.c.bf16 %v894_v62, %v892_v20 }
 0x1af   : > { %1018 = vmatpush1.bf16.msra.mxu1 %v918_v51 }
 0x1b0   : > { %1019 = vmatprep.subr.bf16.mxu1 %v917_v54  ;;  %v935_v50 = vpop.permute.xlu0 %934 }
 0x1b3   : > { %1020 = vmatpush1.bf16.msra.mxu1 %v916_v11 }
 0x1b6   : > { %1576 = vmatmul.mubr.msk.bf16.vlgmr.msra.gmra.mxu1 %vm2767_vm5, %v1634_v35 }
 0x1b7   : > { %1047 = vmatprep.mubr.bf16.mxu1 %v2821_v21 }
 0x1be   : > { %1577 = vmatmul.mubr.msk.bf16.gmra.mxu1 %vm2767_vm5, %v1635_v17 }
 0x1bf   : > { %1057 = vmatprep.mubr.bf16.mxu1 %v2821_v21 }
 0x1c6   : > { %1578 = vmatmul.mubr.msk.bf16.gmra.mxu1 %vm2767_vm5, %v1636_v40 }
 0x1c7   : > { %1067 = vmatprep.mubr.bf16.mxu1 %v2821_v21 }
 0x1ce   : > { %1579 = vmatmul.mubr.msk.bf16.gmra.mxu1 %vm2767_vm5, %v1637_v57 }
 0x276   : > { %v1039_v5 = vpop.f32.mrf.mxu1 }
 0x277   : > { %v2360_v61 = vadd.f32 %v1039_v5, %v935_v50 }
 0x278   : > { %v1041_v45 = vpop.f32.mrf.mxu1 }
 0x279   : > { %2822 = vst [vmem:[#allocation17_spill] sm:$0xff] %v2360_v61  ;;  %v1094_v63 = vmin.f32 %v2360_v61, 20.0  ;;  %v2384_v58 = vadd.f32 %v1041_v45, %v935_v50 }
 0x27a   : > { %v1043_v2 = vpop.f32.mrf.mxu1 }
 0x27b   : > { %v2363_v32 = vadd.f32 %v1043_v2, %v2358_v4  ;;  %v1110_v37 = vmul.f32 1.442695, %v1094_v63  ;;  %2825 = vst [vmem:[#allocation20_spill] sm:$0xff] %v2384_v58  ;;  %v1095_v0 = vmin.f32 %v2384_v58, 20.0 }
 0x27c   : > { %v2356_v43 = vpop.f32.mrf.mxu1 }
 0x27d   : > { %2823 = vst [vmem:[#allocation16_spill] sm:$0xff] %v2363_v32  ;;  %v1096_v10 = vmin.f32 %v2363_v32, 20.0  ;;  %1703 = vpow2.f32 %v1110_v37  ;;  %v1112_v11 = vmul.f32 1.442695, %v1095_v0 }
 0x27e   : > { %v1049_v47 = vpop.f32.mrf.mxu1 }
 0x27f   : > { %v2367_v52 = vadd.f32 %v1049_v47, %v945_v8  ;;  %v1114_v28 = vmul.f32 1.442695, %v1096_v10 }
 0x280   : > { %v1051_v29 = vpop.f32.mrf.mxu1 }
 0x281   : > { %2824 = vst [vmem:[#allocation21_spill] sm:$0xff] %v2367_v52  ;;  %v2371_v49 = vadd.f32 %v1051_v29, %v945_v8  ;;  %v1098_v56 = vmin.f32 %v2367_v52, 20.0  ;;  %1705 = vpow2.f32 %v1114_v28 }
 0x282   : > { %v1053_v30 = vpop.f32.mrf.mxu1 }
 0x283   : > { %v2369_v31 = vadd.f32 %v1053_v30, %v950_v53  ;;  %v1099_v39 = vmin.f32 %v2371_v49, 20.0  ;;  %v1118_v22 = vmul.f32 1.442695, %v1098_v56  ;;  %vm1083_vm11 = vcmp.gt.f32.partialorder %v2371_v49, 20.0 }
 0x284   : > { %v1055_v33 = vpop.f32.mrf.mxu1 }
 0x285   : > { %v1100_v7 = vmin.f32 %v2369_v31, 20.0  ;;  %v1120_v14 = vmul.f32 1.442695, %v1099_v39  ;;  %1707 = vpow2.f32 %v1118_v22  ;;  %v2389_v1 = vadd.f32 %v1055_v33, %v950_v53 }
 0x286   : > { %v1059_v6 = vpop.f32.mrf.mxu1 }
 0x287   : > { %v2374_v41 = vadd.f32 %v1059_v6, %v955_v18  ;;  %v1122_v48 = vmul.f32 1.442695, %v1100_v7  ;;  %v1101_v15 = vmin.f32 %v2389_v1, 20.0 }
 0x288   : > { %v1061_v23 = vpop.f32.mrf.mxu1 }
 0x289   : > { %v2378_v36 = vadd.f32 %v1061_v23, %v955_v18  ;;  %v1102_v9 = vmin.f32 %v2374_v41, 20.0  ;;  %1709 = vpow2.f32 %v1122_v48  ;;  %v2412_v18 = vadd.f32 %v2356_v43, %v2358_v4 }
 0x28a   : > { %v1063_v59 = vpop.f32.mrf.mxu1  ;;  %1711 = vpow2.f32 %v1120_v14  ;;  %v2400_v21 = vpop.eup %1703  ;;  %vm1086_vm15 = vcmp.gt.f32.partialorder %v2374_v41, 20.0 }
 0x28b   : > { %v1103_v16 = vmin.f32 %v2378_v36, 20.0  ;;  %v2382_v42 = vadd.f32 %v1063_v59, %v960_v60  ;;  %v1126_v19 = vmul.f32 1.442695, %v1102_v9  ;;  %2826 = vst [vmem:[#allocation18_spill] sm:$0xff] %v2400_v21  ;;  %v1142_v53 = vadd.f32 1.0, %v2400_v21 }
 0x28c   : > { %v1065_v3 = vpop.f32.mrf.mxu1  ;;  %v1097_v47 = vmin.f32 %v2412_v18, 20.0  ;;  %v1145_v22 = vmul.f32 -0.5, %v2400_v21 }
 0x28d   : > { %v2386_v13 = vadd.f32 %v1065_v3, %v960_v60  ;;  %v1104_v25 = vmin.f32 %v2382_v42, 20.0  ;;  %v1128_v51 = vmul.f32 1.442695, %v1103_v16  ;;  %1713 = vpow2.f32 %v1126_v19 }
 0x28e   : > { %v1069_v27 = vpop.f32.mrf.mxu1  ;;  %v1124_v60 = vmul.f32 1.442695, %v1101_v15  ;;  %v1116_v30 = vmul.f32 1.442695, %v1097_v47 }
 0x28f   : > { %v1130_v24 = vmul.f32 1.442695, %v1104_v25  ;;  %v1105_v46 = vmin.f32 %v2386_v13, 20.0  ;;  %v2393_v38 = vadd.f32 %v1069_v27, %v965_v12  ;;  %1715 = vpow2.f32 %v1128_v51 }
 0x290   : > { %v1071_v54 = vpop.f32.mrf.mxu1 }
 0x291   : > { %v1132_v55 = vmul.f32 1.442695, %v1105_v46  ;;  %v2395_v26 = vadd.f32 %v1071_v54, %v965_v12  ;;  %1717 = vpow2.f32 %v1130_v24  ;;  %v1106_v20 = vmin.f32 %v2393_v38, 20.0  ;;  %v2408_v12 = vpop.eup %1705 }
 0x292   : > { %v1073_v44 = vpop.f32.mrf.mxu1  ;;  %v1160_v45 = vadd.f32 1.0, %v2408_v12  ;;  %v2418_v50 = vpop.eup %1707  ;;  %v1163_v23 = vmul.f32 -0.5, %v2408_v12  ;;  %v2453_v24 = vadd.f32 1.0, %v1145_v22 }
 0x293   : > { %1719 = vpow2.f32 %v1132_v55  ;;  %v1107_v35 = vmin.f32 %v2395_v26, 20.0  ;;  %v1134_v17 = vmul.f32 1.442695, %v1106_v20  ;;  %v2403_v40 = vadd.f32 %v1073_v44, %v2354_v34 }
 0x294   : > { %v1075_v62 = vpop.f32.mrf.mxu1  ;;  %v1178_v63 = vadd.f32 1.0, %v2418_v50  ;;  %v1181_v48 = vmul.f32 -0.5, %v2418_v50  ;;  %v1164_v27 = vadd.f32 1.0, %v1163_v23  ;;  %2827 = vst [vmem:[#allocation19_spill] sm:$0xff] %v2453_v24  ;;  %vm1091_vm12 = vcmp.gt.f32.partialorder %v2395_v26, 20.0 }
 0x295   : > { %v2406_v57 = vadd.f32 %v1075_v62, %v2354_v34  ;;  %1721 = vpow2.f32 %v1134_v17  ;;  %v1136_v8 = vmul.f32 1.442695, %v1107_v35  ;;  %v1108_v5 = vmin.f32 %v2403_v40, 20.0 }
 0x296   : > { %1723 = vpow2.f32 %v1112_v11  ;;  %v2421_v43 = vpop.eup %1709  ;;  %v1182_v44 = vadd.f32 1.0, %v1181_v48  ;;  %vm1092_vm10 = vcmp.gt.f32.partialorder %v2403_v40, 20.0 }
 0x297   : > { %1725 = vpow2.f32 %v1136_v8  ;;  %v1138_v2 = vmul.f32 1.442695, %v1108_v5  ;;  %v1109_v34 = vmin.f32 %v2406_v57, 20.0  ;;  %v2423_v29 = vpop.eup %1711  ;;  %v1196_v37 = vadd.f32 1.0, %v2421_v43 }
 0x298   : > { %1727 = vpow2.f32 %v1124_v60  ;;  %v1187_v56 = vadd.f32 1.0, %v2423_v29  ;;  %v1199_v14 = vmul.f32 -0.5, %v2421_v43  ;;  %v2464_v60 = vmul.f32 %v2408_v12, %v1164_v27 }
 0x299   : > { %1729 = vpow2.f32 %v1138_v2  ;;  %v1140_v4 = vmul.f32 1.442695, %v1109_v34  ;;  %v1190_v5 = vmul.f32 -0.5, %v2423_v29  ;;  %v2474_v47 = vmul.f32 %v2418_v50, %v1182_v44 }
 0x29a   : > { %1731 = vlog2.f32 %v1142_v53  ;;  %v2426_v10 = vpop.eup %1713  ;;  %v1200_v62 = vadd.f32 1.0, %v1199_v14  ;;  %2828 = vst [vmem:[#allocation22_spill] sm:$0xff] %v2464_v60  ;;  %vm1093_vm4 = vcmp.gt.f32.partialorder %v2406_v57, 20.0  ;;  %v2848_v24 = vand.u32 2147483647, %v2421_v43 }
 0x29b   : > { %1733 = vlog2.f32 %v1160_v45  ;;  %v1214_v7 = vadd.f32 1.0, %v2426_v10  ;;  %v1217_v15 = vmul.f32 -0.5, %v2426_v10  ;;  %v1191_v48 = vadd.f32 1.0, %v1190_v5 }
 0x29c   : > { %1735 = vpow2.f32 %v1140_v4  ;;  %v2428_v33 = vpop.eup %1715  ;;  %vm2567_vm5 = vcmp.lt.f32.partialorder %v2848_v24, 0.0004427343 }
 0x29d   : > { %1737 = vlog2.f32 %v1178_v63  ;;  %v1223_v39 = vadd.f32 1.0, %v2428_v33  ;;  %v1226_v8 = vmul.f32 -0.5, %v2428_v33  ;;  %v1218_v63 = vadd.f32 1.0, %v1217_v15 }
 0x29e   : > { %v2431_v28 = vpop.eup %1717  ;;  %1739 = vpow2.f32 %v1116_v30 }
 0x29f   : > { %1741 = vlog2.f32 %v1196_v37  ;;  %v1232_v9 = vadd.f32 1.0, %v2431_v28  ;;  %v1235_v2 = vmul.f32 -0.5, %v2431_v28  ;;  %v2492_v44 = vmul.f32 %v2426_v10, %v1218_v63 }
 0x2a0   : > { %v2434_v6 = vpop.eup %1719  ;;  %1743 = vlog2.f32 %v1187_v56  ;;  %v2481_v56 = vmul.f32 %v2421_v43, %v1200_v62  ;;  %v1238_v15 = vand.u32 2147483647, %v2431_v28 }
 0x2a1   : > { %v1241_v16 = vadd.f32 1.0, %v2434_v6  ;;  %1745 = vlog2.f32 %v1214_v7  ;;  %v1220_v7 = vand.u32 2147483647, %v2426_v10  ;;  %v1236_v14 = vadd.f32 1.0, %v1235_v2 }
 0x2a2   : > { %v2441_v59 = vpop.eup %1721  ;;  %1747 = vlog2.f32 %v1223_v39  ;;  %v1244_v27 = vmul.f32 -0.5, %v2434_v6  ;;  %v1247_v62 = vand.u32 2147483647, %v2434_v6  ;;  %vm2518_vm7 = vcmp.lt.f32.partialorder %v1238_v15, 0.0004427343 }
 0x2a3   : > { %v2445_v3 = vpop.eup %1723  ;;  %v1250_v19 = vadd.f32 1.0, %v2441_v59  ;;  %1749 = vlog2.f32 %v1232_v9  ;;  %v1227_v9 = vadd.f32 1.0, %v1226_v8  ;;  %v1256_v8 = vand.u32 2147483647, %v2441_v59 }
 0x2a4   : > { %v2449_v25 = vpop.eup %1725  ;;  %1751 = vlog2.f32 %v1241_v16  ;;  %v1151_v35 = vadd.f32 1.0, %v2445_v3  ;;  %v2508_v55 = vmul.f32 %v2431_v28, %v1236_v14  ;;  %v1245_v4 = vadd.f32 1.0, %v1244_v27 }
 0x2a5   : > { %v2451_v51 = vpop.eup %1727  ;;  %v1259_v54 = vadd.f32 1.0, %v2449_v25  ;;  %1753 = vlog2.f32 %v1250_v19  ;;  %v1229_v19 = vand.u32 2147483647, %v2428_v33  ;;  %v1262_v2 = vmul.f32 -0.5, %v2449_v25 }
 0x2a6   : > { %v2457_v0 = vpop.eup %1729  ;;  %v1205_v34 = vadd.f32 1.0, %v2451_v51  ;;  %v1265_v10 = vand.u32 2147483647, %v2449_v25  ;;  %v2505_v63 = vmul.f32 %v2428_v33, %v1227_v9  ;;  %vm2522_vm8 = vcmp.lt.f32.partialorder %v1247_v62, 0.0004427343 }
 0x2a7   : > { %v1732_v20 = vpop.eup %1731  ;;  %v1268_v11 = vadd.f32 1.0, %v2457_v0  ;;  %1755 = vlog2.f32 %v1259_v54  ;;  %v1271_v5 = vmul.f32 -0.5, %v2457_v0  ;;  %vm2511_vm6 = vcmp.lt.f32.partialorder %v1229_v19, 0.0004427343 }
 0x2a8   : > { %v1734_v17 = vpop.eup %1733  ;;  %v2478_v37 = vmul.f32 0.6931472, %v1732_v20  ;;  %v1253_v20 = vmul.f32 -0.5, %v2441_v59  ;;  %v1208_v9 = vmul.f32 -0.5, %v2451_v51  ;;  %vm2527_vm9 = vcmp.lt.f32.partialorder %v1256_v8, 0.0004427343 }
 0x2a9   : > { %v2468_v53 = vpop.eup %1735  ;;  %1757 = vlog2.f32 %v1268_v11  ;;  %v2485_v22 = vmul.f32 0.6931472, %v1734_v17  ;;  %v1272_v27 = vadd.f32 1.0, %v1271_v5  ;;  %vm2541_vm14 = vcmp.lt.f32.partialorder %v1265_v10, 0.0004427343 }
 0x2aa   : > { %v1277_v30 = vadd.f32 1.0, %v2468_v53  ;;  %2829 = vst [vmem:[#allocation23_spill] sm:$0xff] %v2478_v37  ;;  %v1738_v39 = vpop.eup %1737  ;;  %v2546_v8 = vmul.f32 %v2423_v29, %v1191_v48  ;;  %vm2551_vm0 = vcmp.lt.f32.partialorder %v1220_v7, 0.0004427343  ;;  %v1209_v7 = vadd.f32 1.0, %v1208_v9 }
 0x2ab   : > { %2830 = vst [vmem:[#allocation24_spill] sm:$0xff] %v2485_v22  ;;  %v2487_v16 = vpop.eup %1739  ;;  %v2497_v17 = vmul.f32 0.6931472, %v1738_v39  ;;  %v1280_v39 = vmul.f32 -0.5, %v2468_v53 }
 0x2ac   : > { %1759 = vlog2.f32 %v1277_v30  ;;  %v1742_v54 = vpop.eup %1741  ;;  %v1274_v30 = vand.u32 2147483647, %v2457_v0  ;;  %v1169_v23 = vadd.f32 1.0, %v2487_v16 }
 0x2ad   : > { %1761 = vlog2.f32 %v1205_v34  ;;  %v1744_v11 = vpop.eup %1743  ;;  %v2516_v32 = vmul.f32 0.6931472, %v1742_v54  ;;  %v1263_v54 = vadd.f32 1.0, %v1262_v2  ;;  %v1281_v5 = vadd.f32 1.0, %v1280_v39 }
 0x2ae   : > { %v1746_v34 = vpop.eup %1745  ;;  %1763 = vlog2.f32 %v1151_v35  ;;  %v1254_v35 = vadd.f32 1.0, %v1253_v20  ;;  %vm2536_vm13 = vcmp.lt.f32.partialorder %v1274_v30, 0.0004427343  ;;  %v1283_v2 = vand.u32 2147483647, %v2468_v53 }
 0x2af   : > { %v1748_v46 = vpop.eup %1747  ;;  %1765 = vlog2.f32 %v1169_v23  ;;  %v2532_v37 = vmul.f32 0.6931472, %v1746_v34  ;;  %v1246_v30 = vmul.f32 %v2434_v6, %v1245_v4  ;;  %v2845_v6 = vand.u32 2147483647, %v2423_v29 }
 0x2b0   : > { %v1750_v61 = vpop.eup %1749  ;;  %v1225_v34 = vmul.f32 0.6931472, %v1748_v46  ;;  %v1255_v48 = vmul.f32 %v2441_v59, %v1254_v35  ;;  %v1273_v46 = vmul.f32 %v2457_v0, %v1272_v27  ;;  %v1264_v59 = vmul.f32 %v2449_v25, %v1263_v54 }
 0x2b1   : > { %v1752_v14 = vpop.eup %1751  ;;  %v1234_v10 = vmul.f32 0.6931472, %v1750_v61  ;;  %vm2561_vm3 = vcmp.lt.f32.partialorder %v2845_v6, 0.0004427343  ;;  %v1211_v0 = vand.u32 2147483647, %v2451_v51  ;;  %v1282_v24 = vmul.f32 %v2468_v53, %v1281_v5 }
 0x2b2   : > { %v1754_v15 = vpop.eup %1753  ;;  %v1243_v22 = vmul.f32 0.6931472, %v1752_v14  ;;  %v1154_v29 = vmul.f32 -0.5, %v2445_v3  ;;  %v2851_v14 = vand.u32 2147483647, %v2418_v50  ;;  %v2875_v9 = vld [vmem:[#allocation23_spill] sm:$0xff] }
 0x2b3   : > { %v1252_v39 = vmul.f32 0.6931472, %v1754_v15  ;;  %vm2585_vm1 = vcmp.lt.f32.partialorder %v1283_v2, 0.0004427343  ;;  %v1231_v15 = vsel %vm2511_vm6, %v2505_v63, %v1225_v34  ;;  %v1240_v53 = vsel %vm2518_vm7, %v2508_v55, %v1234_v10  ;;  %v1322_v63 = vpop.permute.xlu1 %1321 }
 0x2b4   : > { %v1756_v23 = vpop.eup %1755  ;;  %vm2577_vm2 = vcmp.lt.f32.partialorder %v2851_v14, 0.0004427343  ;;  %vm2611_vm6 = vcmp.lt.f32.partialorder %v1211_v0, 0.0004427343  ;;  %v1155_v55 = vadd.f32 1.0, %v1154_v29  ;;  %vm2858_vm7 = vcmp.gt.f32.partialorder %v2386_v13, 20.0 }
 0x2b5   : > { %v1261_v60 = vmul.f32 0.6931472, %v1756_v23  ;;  %v1258_v20 = vsel %vm2527_vm9, %v1255_v48, %v1252_v39  ;;  %v1175_v34 = vand.u32 2147483647, %v2487_v16  ;;  %vm2860_vm9 = vcmp.gt.f32.partialorder %v2378_v36, 20.0  ;;  %v2872_v0 = vld [vmem:[#allocation21_spill] sm:$0xff] }
 0x2b6   : > { %v1758_v58 = vpop.eup %1757 }
 0x2b7   : > { %v1270_v21 = vmul.f32 0.6931472, %v1758_v58  ;;  %v1189_v58 = vmul.f32 0.6931472, %v1744_v11  ;;  %v1172_v11 = vmul.f32 -0.5, %v2487_v16  ;;  %v1267_v50 = vsel %vm2541_vm14, %v1264_v59, %v1261_v60  ;;  %v2870_v59 = vld [vmem:[#allocation24_spill] sm:$0xff] }
 0x2b8   : > { %v1210_v60 = vmul.f32 %v2451_v51, %v1209_v7  ;;  %vm1081_vm14 = vcmp.gt.f32.partialorder %v2412_v18, 20.0  ;;  %v1299_v28 = vsel %vm1091_vm12, %v2395_v26, %v1267_v50  ;;  %v1222_v26 = vsel %vm2551_vm0, %v2492_v44, %v2532_v37  ;;  %v2869_v7 = vld [vmem:[#allocation18_spill] sm:$0xff] }
 0x2b9   : > { %v1760_v35 = vpop.eup %1759  ;;  %v1276_v43 = vsel %vm2536_vm13, %v1273_v46, %v1270_v21  ;;  %v1249_v21 = vsel %vm2522_vm8, %v1246_v30, %v1243_v22  ;;  %vm1084_vm13 = vcmp.gt.f32.partialorder %v2369_v31, 20.0  ;;  %v1173_v19 = vadd.f32 1.0, %v1172_v11 }
 0x2ba   : > { %v1762_v27 = vpop.eup %1761  ;;  %v1279_v54 = vmul.f32 0.6931472, %v1760_v35  ;;  %v1300_v45 = vsel %vm1092_vm10, %v2403_v40, %v1276_v43  ;;  %v1297_v40 = vsel %vm2858_vm7, %v2386_v13, %v1249_v21  ;;  %vm2859_vm8 = vcmp.gt.f32.partialorder %v2393_v38, 20.0  ;;  %v2874_v35 = vld [vmem:[#allocation20_spill] sm:$0xff]  ;;  %v1638_v21 = vld [vmem:[%s2735_s4] sm:$0x3f]  }
 0x2bb   : > { %v1207_v23 = vmul.f32 0.6931472, %v1762_v27  ;;  %v1764_v33 = vpop.eup %1763  ;;  %v1298_v62 = vsel %vm2859_vm8, %v2393_v38, %v1258_v20  ;;  %v1295_v13 = vsel %vm2860_vm9, %v2378_v36, %v1231_v15  ;;  %v1157_v30 = vand.u32 2147483647, %v2445_v3 }
 0x2bc   : > { %v1285_v22 = vsel %vm2585_vm1, %v1282_v24, %v1279_v54  ;;  %v1766_v10 = vpop.eup %1765  ;;  %vm2861_vm10 = vcmp.gt.f32.partialorder %v2382_v42, 20.0  ;;  %v1309_v48 = vpack.c.bf16 %v1297_v40, %v1295_v13  ;;  %v1195_v39 = vsel %vm2561_vm3, %v2546_v8, %v1189_v58  ;;  %v2871_v58 = vld [vmem:[#allocation22_spill] sm:$0xff]  ;;  %v2876_v24 = vld [vmem:[#allocation16_spill] sm:$0xff]  ;;  %v2877_v54 = vld [vmem:[#allocation17_spill] sm:$0xff] }
 0x2bd   : > { %v1301_v51 = vsel %vm1093_vm4, %v2406_v57, %v1285_v22  ;;  %v1213_v2 = vsel %vm2611_vm6, %v1210_v60, %v1207_v23  ;;  %v1310_v57 = vpack.c.bf16 %v1300_v45, %v1298_v62  ;;  %v1296_v38 = vsel %vm2861_vm10, %v2382_v42, %v1240_v53  ;;  %v1317_v53 = vpop.permute.xlu0 %1316 }
 0x2be   : > { %v1311_v5 = vpack.c.bf16 %v1301_v51, %v1299_v28  ;;  %v1153_v52 = vmul.f32 0.6931472, %v1764_v33  ;;  %v1204_v37 = vsel %vm2567_vm5, %v2481_v56, %v2516_v32  ;;  %vm2862_vm12 = vcmp.gt.f32.partialorder %v2389_v1, 20.0 }
 0x2bf   : > { %v1293_v36 = vsel %vm2862_vm12, %v2389_v1, %v1213_v2  ;;  %v1171_v44 = vmul.f32 0.6931472, %v1766_v10  ;;  %v1174_v42 = vmul.f32 %v2487_v16, %v1173_v19  ;;  %v1186_v46 = vsel %vm2577_vm2, %v2474_v47, %v2497_v17 }
 0x2c0   : > { %1340 = vmatprep.subr.bf16.mxu0 %v1311_v5  ;;  %v1294_v8 = vsel %vm1086_vm15, %v2374_v41, %v1222_v26  ;;  %v1156_v32 = vmul.f32 %v2445_v3, %v1155_v55  ;;  %vm1176_vm5 = vcmp.lt.f32.partialorder %v1175_v34, 0.0004427343  ;;  %v1291_v1 = vsel %vm1083_vm11, %v2371_v49, %v1195_v39  ;;  %v2868_v49 = vld [vmem:[#allocation19_spill] sm:$0xff] }
 0x2c1   : > { %1341 = vmatpush1.bf16.msra.mxu0 %v1310_v57  ;;  %v1308_v56 = vpack.c.bf16 %v1296_v38, %v1294_v8  ;;  %vm2663_vm4 = vcmp.lt.f32.partialorder %v1157_v30, 0.0004427343  ;;  %v1177_v6 = vsel %vm1176_vm5, %v1174_v42, %v1171_v44  ;;  %v2865_v47 = vand.u32 2147483647, %v2408_v12 }
 0x2c2   : > { %1342 = vmatprep.subr.bf16.mxu0 %v1309_v48  ;;  %v1292_v41 = vsel %vm1084_vm13, %v2369_v31, %v1204_v37  ;;  %v1307_v3 = vpack.c.bf16 %v1293_v36, %v1291_v1  ;;  %v1159_v4 = vsel %vm2663_vm4, %v1156_v32, %v1153_v52  ;;  %v1147_v61 = vmul.f32 %v2869_v7, %v2868_v49  ;;  %v2879_v52 = vld [vmem:[#allocation15_spill] sm:$0xff] }
 0x2c3   : > { %vm2669_vm0 = vcmp.lt.f32.partialorder %v2865_v47, 0.0004427343  ;;  %vm1082_vm11 = vcmp.gt.f32.partialorder %v2872_v0, 20.0  ;;  %v1289_v29 = vsel %vm1081_vm14, %v2412_v18, %v1177_v6  ;;  %v2873_v31 = vand.u32 2147483647, %v2869_v7 }
 0x2c4   : > { %v1168_v12 = vsel %vm2669_vm0, %v2871_v58, %v2870_v59  ;;  %vm1079_vm1 = vcmp.gt.f32.partialorder %v2874_v35, 20.0  ;;  %v1290_v14 = vsel %vm1082_vm11, %v2872_v0, %v1186_v46  ;;  %vm1080_vm2 = vcmp.gt.f32.partialorder %v2876_v24, 20.0 }
 0x2c5   : > { %1343 = vmatpush1.bf16.msra.mxu0 %v1308_v56  ;;  %vm1149_vm15 = vcmp.lt.f32.partialorder %v2873_v31, 0.0004427343  ;;  %v1306_v25 = vpack.c.bf16 %v1292_v41, %v1290_v14  ;;  %v1287_v11 = vsel %vm1079_vm1, %v2874_v35, %v1159_v4  ;;  %v1288_v27 = vsel %vm1080_vm2, %v2876_v24, %v1168_v12 }
 0x2c6   : > { %1344 = vmatprep.subr.bf16.mxu0 %v1307_v3  ;;  %v1150_v43 = vsel %vm1149_vm15, %v1147_v61, %v2875_v9  ;;  %v1305_v50 = vpack.c.bf16 %v1289_v29, %v1287_v11  ;;  %vm1078_vm3 = vcmp.gt.f32.partialorder %v2877_v54, 20.0  ;;  %vm2878_vm13 = vcmask 523264  }
 0x2c7   : > { %v1286_v18 = vsel %vm1078_vm3, %v2877_v54, %v1150_v43  ;;  %vm1428_vm14 = vcmp.le.s32.totalorder %v2879_v52, 3  ;;  %vm1426_vm6 = vcmp.eq.s32.totalorder %v2879_v52, 0 }
 0x2c8   : > { %v1304_v15 = vpack.c.bf16 %v1288_v27, %v1286_v18 }
 0x2c9   : > { %1345 = vmatpush1.bf16.msra.mxu0 %v1306_v25 }
 0x2ca   : > { %1346 = vmatprep.subr.bf16.mxu0 %v1305_v50 }
 0x2cd   : > { %1347 = vmatpush1.bf16.msra.mxu0 %v1304_v15 }
 0x2d0   : > { %1581 = vmatmul.mubr.msk.bf16.vlgmr.msra.gmra.mxu0 %vm2878_vm13, %v1638_v21 }
 0x390   : > { %v1366_v20 = vpop.f32.mrf.mxu0 }
 0x391   : > { %v1367_v23 = vadd.f32 %v1366_v20, %v1317_v53 }
 0x392   : > { %v1368_v60 = vpop.f32.mrf.mxu0 }
 0x393   : > { %v1582_v45 = vmul.f32 -1.442695, %v1367_v23  ;;  %v1369_v22 = vadd.f32 %v1368_v60, %v1317_v53  ;;  %v1378_v44 = vadd.f32 10.0, %v1367_v23 }
 0x394   : > { %v1370_v55 = vpop.f32.mrf.mxu0 }
 0x395   : > { %1767 = vpow2.f32 %v1582_v45  ;;  %v1583_v33 = vmul.f32 -1.442695, %v1369_v22  ;;  %v1371_v28 = vadd.f32 %v1370_v55, %v1322_v63  ;;  %v1379_v32 = vadd.f32 10.0, %v1369_v22 }
 0x396   : > { %v1372_v51 = vpop.f32.mrf.mxu0 }
 0x397   : > { %1769 = vpow2.f32 %v1583_v33  ;;  %v1416_v40 = vmax.f32 %v1371_v28, 0.0  ;;  %v1373_v19 = vadd.f32 %v1372_v51, %v1322_v63 }
 0x399   : > { %v1420_v62 = vmul.f32 -1.0, %v1416_v40  ;;  %v1417_v5 = vmax.f32 %v1373_v19, 0.0 }
 0x39b   : > { %v1592_v2 = vadd.f32 -5.0, %v1420_v62  ;;  %v1421_v34 = vmul.f32 -1.0, %v1417_v5 }
 0x39d   : > { %1446 = vst [vmem:[%s2703_s29 + $0x10] sm:$0x7] %v1592_v2  ;;  %v1593_v26 = vadd.f32 -5.0, %v1421_v34 }
 0x39f   : > { %1447 = vst [vmem:[%s2703_s29 + $0x18] sm:$0x7] %v1593_v26 }
 0x3a2   : > { %v1768_v57 = vpop.eup %1767 }
 0x3a3   : > { %v1394_v13 = vadd.f32 1.0, %v1768_v57 }
 0x3a4   : > { %v1770_v30 = vpop.eup %1769  ;;  %v1474_v47 = vld [vmem:[%s2703_s29 + $0x10] sm:$0xff] (%p1886_p4) }
 0x3a5   : > { %1771 = vrcp.f32 %v1394_v13  ;;  %v1395_v10 = vadd.f32 1.0, %v1770_v30  ;;  %1475 = vst [vmem:[%s1457_s12 + $0x20] sm:$0xff] (%p1886_p4), %v1474_v47 }
 0x3a6   : > { %v1476_v17 = vld [vmem:[%s2703_s29 + $0x18] sm:$0xff] (%p1886_p4) }
 0x3a7   : > { %1773 = vrcp.f32 %v1395_v10  ;;  %1477 = vst [vmem:[%s1457_s12 + $0x28] sm:$0xff] (%p1886_p4), %v1476_v17 }
 0x3b2   : > { %v1772_v38 = vpop.eup %1771 }
 0x3b3   : > { %v1406_v48 = vmul.f32 1.002, %v1772_v38 }
 0x3b4   : > { %v1774_v39 = vpop.eup %1773 }
 0x3b5   : > { %v1586_v37 = vadd.f32 -0.001, %v1406_v48  ;;  %v1407_v36 = vmul.f32 1.002, %v1774_v39 }
 0x3b7   : > { %v1436_v42 = vsel %vm1428_vm14, %v1586_v37, %v1367_v23  ;;  %v1587_v46 = vadd.f32 -0.001, %v1407_v36  ;;  %1454 = sbr.rel (!%p1886_p4) target bundleno = 964 (0x3c4), region = 60 }
 0x3b8   : > { %v1440_v8 = vsel %vm1426_vm6, %v1378_v44, %v1436_v42 }
 0x3b9   : > { %v1437_v56 = vsel %vm1428_vm14, %v1587_v46, %v1369_v22  ;;  %1444 = vst [vmem:[%s2703_s29] sm:$0xff] %v1440_v8 }
 0x3ba   : > { %v1441_v1 = vsel %vm1426_vm6, %v1379_v32, %v1437_v56 }
 0x3bb   : > { %1445 = vst [vmem:[%s2703_s29 + $0x8] sm:$0xff] %v1441_v1 }
 0x3c0   : > { %v1470_v16 = vld [vmem:[%s2703_s29] sm:$0xff] }
 0x3c1   : > { %1471 = vst [vmem:[%s1457_s12] sm:$0xff] %v1470_v16 }
 0x3c2   : > { %v1472_v6 = vld [vmem:[%s2703_s29 + $0x8] sm:$0xff] }
 0x3c3   : > { %1473 = vst [vmem:[%s1457_s12 + $0x8] sm:$0xff] %v1472_v6 }
 0x3c4 PF: > { %p27_p8 = scmp.ge.s32.totalorder %s1876_s18, 4   ;;  %s2880_s15 = smov %s1793_s16 }
 0x3c5   : > { %s2881_s16 = smov %s1884_s21  ;;  %s2882_s17 = smov %s1876_s18 }
 0x3c6   :  { %29 = sbr.rel (!%p27_p8) target bundleno = 7 (0x7), region = 116 }

</bundles_post_ra>
